<compile_context>
chip_gen: v5e
topology: v5e:2x2
jax: 0.10.0
libtpu: 0.0.40
codegen_flags: <defaults>
</compile_context>

<pallas_src>
import numpy as np

import jax
import jax.numpy as jnp
from jax.experimental import pallas as pl
from jax.experimental.pallas import tpu as pltpu


def _round_up(n, m):
    return ((n + m - 1) // m) * m


# ----------------------------- kernels ---------------------------------------

def _linear_relu_kernel(x_ref, w_ref, b_ref, o_ref):
    """Single-K-step fast path: no accumulator scratch, one MXU dot per tile."""
    acc = jnp.dot(x_ref[...], w_ref[...], preferred_element_type=jnp.float32)
    o_ref[...] = jnp.maximum(acc + b_ref[...], 0.0).astype(o_ref.dtype)


def _linear_relu_acc_kernel(x_ref, w_ref, b_ref, o_ref, acc_ref):
    """Multi-K-step path: f32 VMEM accumulator with pl.when init/finalize."""
    k = pl.program_id(2)

    @pl.when(k == 0)
    def _():
        acc_ref[...] = jnp.zeros_like(acc_ref)

    acc_ref[...] += jnp.dot(x_ref[...], w_ref[...],
                            preferred_element_type=jnp.float32)

    @pl.when(k == pl.num_programs(2) - 1)
    def _():
        o_ref[...] = jnp.maximum(acc_ref[...] + b_ref[...], 0.0).astype(o_ref.dtype)


# ----------------------------- wrapper ----------------------------------------

def basic_block(x, weight, bias=None, *, tm=None, tn=None, tk=None,
                compute_dtype=jnp.bfloat16, weight_buffers=2):
    """y = relu(x @ weight + bias).

    x: (..., dim_in); weight: (dim_in, dim_out); bias: (dim_out,) or None.
    compute_dtype: operand dtype fed to the MXU (default bf16; accumulation is
    always f32; pass jnp.float32 / None to keep f32 operands).
    """
    orig_shape = x.shape
    dim_in = orig_shape[-1]
    assert weight.shape[0] == dim_in, (weight.shape, dim_in)
    dim_out = weight.shape[1]
    out_dtype = x.dtype

    x2 = x.reshape(-1, dim_in)
    B = x2.shape[0]

    if compute_dtype is None:
        compute_dtype = out_dtype
    itemsize = np.dtype(compute_dtype).itemsize
    out_itemsize = np.dtype(out_dtype).itemsize
    sublane = 16 if itemsize < 4 else 8          # sub-32-bit packs 2 rows/sublane

    # Cast BEFORE any padding copy (halves remaining pad traffic for bf16).
    x2 = x2.astype(compute_dtype)
    w = weight.astype(compute_dtype)
    if bias is None:
        bias = jnp.zeros((dim_out,), jnp.float32)
    b2 = bias.astype(jnp.float32).reshape(1, dim_out)

    # ---- tile selection (lane-dense, sized to the VMEM budget) --------------
    tm_cap = 1024 if itemsize < 4 else 512
    tk_cap = 2048 if itemsize < 4 else 1024
    tn_cap = 512

    if tk is None:
        tk = dim_in if dim_in <= tk_cap else tk_cap
    if tn is None:
        tn = dim_out if dim_out <= tn_cap else tn_cap
    if tm is None:
        # Largest packing-granule multiple that still fits inside B (avoids
        # oversized single blocks); tiny batches keep a minimal 8-row tile.
        tm = min(tm_cap, (B // sublane) * sublane) if B >= sublane else _round_up(B, 8)

    grid_m = pl.cdiv(B, tm)
    grid_n = pl.cdiv(dim_out, tn)
    grid_k = pl.cdiv(dim_in, tk)

    # ---- v7x megacore: guarantee >= 2 steps over the "parallel" axes --------
    if grid_m * grid_n == 1:
        if B >= 2 * sublane:
            tm = _round_up(pl.cdiv(B, 2), sublane)
            grid_m = pl.cdiv(B, tm)
        elif dim_out >= 256:
            tn = _round_up(pl.cdiv(dim_out, 2), 128)
            grid_n = pl.cdiv(dim_out, tn)

    # ---- pad ONLY the reduction axis (must stay zero-filled).  M/N tails are
    # handled by Pallas' masked ragged blocks and never reach the output. -----
    k_pad = grid_k * tk
    if k_pad != dim_in:
        x2 = jnp.pad(x2, ((0, 0), (0, k_pad - dim_in)))
        w = jnp.pad(w, ((0, k_pad - dim_in), (0, 0)))

    # ---- VMEM budget: never clamp below what the pipeline actually needs ----
    need = (2 * tm * tk * itemsize                       # x tile, double-buffered
            + max(weight_buffers, 2) * tk * tn * itemsize  # weight tile(s)
            + 2 * 8 * tn * 4                             # bias tile (sublane pad)
            + 2 * tm * tn * out_itemsize)                # output tile
    if grid_k > 1:
        need += tm * tn * 4                              # f32 accumulator scratch
    vmem_limit = min(max(int(1.4 * need), 32 << 20), 96 << 20)

    cost = pl.CostEstimate(
        flops=2 * B * dim_out * k_pad,
        transcendentals=0,
        bytes_accessed=(B * k_pad * itemsize + k_pad * dim_out * itemsize
                        + dim_out * 4 + B * dim_out * out_itemsize),
    )

    w_spec_kwargs = {}
    if weight_buffers != 2:      # e.g. 3 on v5e to hide the weight K-stream DMA
        w_spec_kwargs["pipeline_mode"] = pl.Buffered(weight_buffers)

    if grid_k == 1:
        # Single K step: no accumulator round-trips, no scratch.
        grid = (grid_m, grid_n)
        in_specs = [
            pl.BlockSpec((tm, tk), lambda i, j: (i, 0)),
            pl.BlockSpec((tk, tn), lambda i, j: (0, j), **w_spec_kwargs),
            pl.BlockSpec((1, tn), lambda i, j: (0, j)),
        ]
        out_spec = pl.BlockSpec((tm, tn), lambda i, j: (i, j))
        scratch = []
        kernel = _linear_relu_kernel
        dims = ("parallel", "parallel")
    else:
        grid = (grid_m, grid_n, grid_k)
        in_specs = [
            pl.BlockSpec((tm, tk), lambda i, j, k: (i, k)),
            pl.BlockSpec((tk, tn), lambda i, j, k: (k, j), **w_spec_kwargs),
            pl.BlockSpec((1, tn), lambda i, j, k: (0, j)),
        ]
        out_spec = pl.BlockSpec((tm, tn), lambda i, j, k: (i, j))
        scratch = [pltpu.VMEM((tm, tn), jnp.float32)]
        kernel = _linear_relu_acc_kernel
        dims = ("parallel", "parallel", "arbitrary")

    out2 = pl.pallas_call(
        kernel,
        out_shape=jax.ShapeDtypeStruct((B, dim_out), out_dtype),
        grid_spec=pltpu.PrefetchScalarGridSpec(
            num_scalar_prefetch=0,
            grid=grid,
            in_specs=in_specs,
            out_specs=out_spec,
            scratch_shapes=scratch,
        ),
        compiler_params=pltpu.CompilerParams(
            dimension_semantics=dims,
            vmem_limit_bytes=vmem_limit,
        ),
        cost_estimate=cost,
    )(x2, w, b2)

    return out2.reshape(orig_shape[:-1] + (dim_out,))


# ----------------------------- references -------------------------------------

def reference_f32(x, w, b):
    return jnp.maximum(x @ w + b[None, :], 0.0)


def reference_bf16(x, w, b):
    y = jnp.dot(x.astype(jnp.bfloat16), w.astype(jnp.bfloat16),
                preferred_element_type=jnp.float32)
    return jnp.maximum(y + b[None, :], 0.0)


if __name__ == "__main__":
    key = jax.random.PRNGKey(0)

    # --- small shape consistent with BasicBlock(dim_in=32, dim_out=64) -------
    B, dim_in, dim_out = 8, 32, 64
    kx, kw, kb = jax.random.split(key, 3)
    x = jax.random.normal(kx, (B, dim_in), dtype=jnp.float32)
    weight = jax.random.normal(kw, (dim_in, dim_out), dtype=jnp.float32) * 0.1
    bias = jax.random.normal(kb, (dim_out,), dtype=jnp.float32) * 0.1

    # (1) f32 operands, exact against the f32 reference (fast single-tile path)
    out = jax.block_until_ready(basic_block(x, weight, bias,
                                            compute_dtype=jnp.float32))
    ref = reference_f32(x, weight, bias)
    assert out.shape == (B, dim_out)
    assert jnp.allclose(out, ref, atol=1e-5, rtol=1e-5), "small f32 mismatch"

    # (2) default bf16 operands (f32 accumulation) against a bf16-cast reference
    out_bf = jax.block_until_ready(basic_block(x, weight, bias))
    ref_bf = reference_bf16(x, weight, bias)
    assert jnp.allclose(out_bf, ref_bf, atol=1e-2, rtol=1e-2), "small bf16 mismatch"

    # --- modest shape: ragged batch, full M/N tiling, single-K fast path -----
    B2, din2, dout2 = 200, 1024, 1024
    kx2, kw2, kb2 = jax.random.split(jax.random.PRNGKey(1), 3)
    x2 = jax.random.normal(kx2, (B2, din2), dtype=jnp.float32)
    w2 = jax.random.normal(kw2, (din2, dout2), dtype=jnp.float32) * 0.05
    b2 = jax.random.normal(kb2, (dout2,), dtype=jnp.float32) * 0.1

    out2 = jax.block_until_ready(basic_block(x2, w2, b2))           # bf16 default
    ref2 = reference_bf16(x2, w2, b2)
    assert out2.shape == (B2, dout2)
    assert jnp.allclose(out2, ref2, atol=1e-2, rtol=1e-2), "tiled bf16 mismatch"

    # (4) force the multi-K accumulator path with explicit f32 tiles ----------
    out3 = jax.block_until_ready(basic_block(x2, w2, b2, tm=128, tn=256, tk=256,
                                             compute_dtype=jnp.float32))
    ref3 = reference_f32(x2, w2, b2)
    assert jnp.allclose(out3, ref3, atol=2e-3, rtol=1e-3), "multi-K f32 mismatch"

    print("KERNEL_OK")
</pallas_src>

<mosaic_0001>
module attributes {stable_mosaic.version = 11 : i64} {
  func.func @_linear_relu_kernel(%arg0: i32, %arg1: i32, %arg2: memref<8x32xf32, #tpu.memory_space<vmem>>, %arg3: memref<32x64xf32, #tpu.memory_space<vmem>>, %arg4: memref<1x64xf32, #tpu.memory_space<vmem>>, %arg5: memref<8x64xf32, #tpu.memory_space<vmem>>) attributes {dimension_semantics = [#tpu.dimension_semantics<parallel>, #tpu.dimension_semantics<parallel>], iteration_bounds = array<i64: 1, 1>, scalar_prefetch = 0 : i64, scratch_operands = 0 : i64, tpu.core_type = #tpu.core_type<tc>, window_params = [{transform_indices = @transform_0, window_bounds = array<i64: 8, 32>}, {transform_indices = @transform_1, window_bounds = array<i64: 32, 64>}, {transform_indices = @transform_2, window_bounds = array<i64: 1, 64>}, {transform_indices = @transform_3, window_bounds = array<i64: 8, 64>}]} {
    %c0 = arith.constant 0 : index
    %c0_0 = arith.constant 0 : index
    %0 = vector.load %arg2[%c0, %c0_0] : memref<8x32xf32, #tpu.memory_space<vmem>>, vector<8x32xf32>
    %c0_1 = arith.constant 0 : index
    %c0_2 = arith.constant 0 : index
    %1 = vector.load %arg3[%c0_1, %c0_2] : memref<32x64xf32, #tpu.memory_space<vmem>>, vector<32x64xf32>
    %cst = arith.constant dense<0.000000e+00> : vector<8x64xf32>
    %2 = tpu.matmul %0, %1, %cst {dimension_numbers = #tpu.dot_dimension_numbers<[1], [0], [0], [1], [0, 0, 1, 1], [], []>} : vector<8x32xf32>, vector<32x64xf32>, vector<8x64xf32> -> vector<8x64xf32>
    %c0_3 = arith.constant 0 : index
    %c0_4 = arith.constant 0 : index
    %3 = vector.load %arg4[%c0_3, %c0_4] : memref<1x64xf32, #tpu.memory_space<vmem>>, vector<1x64xf32>
    %4 = vector.broadcast %3 : vector<1x64xf32> to vector<8x64xf32>
    %5 = arith.addf %2, %4 : vector<8x64xf32>
    %cst_5 = arith.constant 0.000000e+00 : f32
    %6 = vector.broadcast %cst_5 : f32 to vector<8x64xf32>
    %7 = arith.maximumf %5, %6 : vector<8x64xf32>
    %c0_6 = arith.constant 0 : index
    %c0_7 = arith.constant 0 : index
    %8 = vector.load %arg5[%c0_6, %c0_7] : memref<8x64xf32, #tpu.memory_space<vmem>>, vector<8x64xf32>
    tpu.vector_store %arg5[%c0_6, %c0_7], %7 {strides = array<i32>} : memref<8x64xf32, #tpu.memory_space<vmem>>, vector<8x64xf32>,
    return
  }
  func.func @transform_0(%arg0: i32, %arg1: i32) -> (i32, i32) {
    %c0_i32 = arith.constant 0 : i32
    %c0_i32_0 = arith.constant 0 : i32
    return %arg0, %c0_i32 : i32, i32
  }
  func.func @transform_1(%arg0: i32, %arg1: i32) -> (i32, i32) {
    %c0_i32 = arith.constant 0 : i32
    %c0_i32_0 = arith.constant 0 : i32
    return %c0_i32, %arg1 : i32, i32
  }
  func.func @transform_2(%arg0: i32, %arg1: i32) -> (i32, i32) {
    %c0_i32 = arith.constant 0 : i32
    %c0_i32_0 = arith.constant 0 : i32
    return %c0_i32, %arg1 : i32, i32
  }
  func.func @transform_3(%arg0: i32, %arg1: i32) -> (i32, i32) {
    %c0_i32 = arith.constant 0 : i32
    return %arg0, %arg1 : i32, i32
  }
}

</mosaic_0001>

<bundles_post_ra>
// kernel: tpu_custom_call.1
= control target key start
LH: loop header
LB: loop body
LE: loop exit
PB: predicated region body
PF: predicated region fallthrough
CT: control target
= control target key end

     0   :  { %8 = vsyncpa [#allocation3], 0  ;;  %s221_s0 = inlined_call_operand.hbm [shape: f32[8,32], index: 0, kind: input, shape index: {}]   ;;  %s222_s1 = inlined_call_operand.hbm [shape: f32[32,64], index: 1, kind: input, shape index: {}]   ;;  %s223_s2 = inlined_call_operand.vmem [shape: f32[1,64], index: 2, kind: input, shape index: {}]   ;;  %s224_s3 = inlined_call_operand.hbm [shape: f32[8,64], index: 3, kind: output, shape index: {}]  }
   0x1   :  { %9 = vsyncpa [#allocation6], 0 }
   0x2   :  { %10 = vsyncpa [#allocation4], 0  ;;  %s16_s14 = sshll.u32 %s221_s0, 4  ;;  %s184_s15 = smov [#allocation2]   ;;  %s17_s14 = int_to_ptr.hbm [resolvable:$true] %s16_s14 }
   0x3   :  { %s18_s16 = sshll.u32 %s184_s15, 4  ;;  %s26_s19 = sshll.u32 %s222_s1, 4  ;;  %s19_s16 = int_to_ptr.vmem [resolvable:$true] %s18_s16  ;;  %s27_s19 = int_to_ptr.hbm [resolvable:$true] %s26_s19 }
   0x4   :  { %21 = dma.hbm_to_vmem [thread:$0]  %s17_s14, 128, %s19_s16, [#allocation3]  }
   0x5   :  { %s185_s20 = smov [#allocation5]   ;;  %s186_s22 = smov 128  }
   0x6   :  { %s28_s21 = sshll.u32 %s185_s20, 4  ;;  %s187_s23 = smov 8   ;;  %s29_s21 = int_to_ptr.vmem [resolvable:$true] %s28_s21 }
   0x7   :  { %34 = dma.hbm_to_vmem [thread:$0]  %s27_s19, 512, %s29_s21, [#allocation6], %s186_s22, %s186_s22, %s187_s23  }
   0x8   :  { %178 = dma.done.wait [#allocation3], 128  }
   0x9   :  { %179 = vsyncadd [#allocation3], 4294967168 }
   0xa   :  { %180 = dma.done.wait [#allocation6], 512  }
   0xb   :  { %181 = vsyncadd [#allocation6], 4294966784  ;;  %v49_v0 = vld [vmem:[#allocation5 + $0x18] sm:$0xff]  ;;  %v48_v1 = vld [vmem:[#allocation5 + $0x10] sm:$0xff]  ;;  %vm54_vm0 = vcmask 261120   ;;  %s188_s24 = smov [#allocation7]  }
   0xc   :  { %70 = vmatpush.msra.mxu0 %v49_v0  ;;  %v47_v2 = vld [vmem:[#allocation5 + $0x8] sm:$0xff]  ;;  %v46_v3 = vld [vmem:[#allocation5] sm:$0xff]  ;;  %v45_v4 = vld [vmem:[#allocation2] sm:$0xff]  ;;  %s86_s25 = sshll.u32 %s188_s24, 4  ;;  %s88_s28 = sshll.u32 %s224_s3, 4  ;;  %vm79_vm1 = vcmask 523264   ;;  %s87_s25 = int_to_ptr.vmem [resolvable:$true] %s86_s25  ;;  %s89_s28 = int_to_ptr.hbm [resolvable:$true] %s88_s28 }
   0xd   :  { %v105_v5 = vld [vmem:[%s223_s2] ss:$0 sm:$0xff] }
   0xe   :  { %71 = vmatpush.msra.mxu0 %v48_v1 }
  0x10   :  { %72 = vmatpush.msra.mxu0 %v47_v2 }
  0x12   :  { %73 = vmatpush.msra.mxu0 %v46_v3 }
  0x13   :  { %99 = vmatmul.msk.f32.vlgmr.msra.gmra.mxu0 %vm54_vm0, %v45_v4 }
  0x90   :  { %v75_v6 = vpop.f32.mrf.mxu0 }
  0x91   :  { %v76_v7 = vadd.f32 %v105_v5, %v75_v6 }
  0x93   :  { %v78_v8 = vmax.f32 %v76_v7, 0.0 }
  0x95   :  { %80 = vst.msk [vmem:[#allocation7] sm:$0xff] %vm79_vm1, %v78_v8 }
  0x96   :  { %91 = dma.vmem_to_hbm [thread:$0]  %s87_s25, 128, %s89_s28, [#allocation4]  }
  0x97   :  { %182 = dma.done.wait [#allocation4], 128  }
  0x98   :  { %183 = vsyncadd [#allocation4], 4294967168 }
  0x99   :  { %96 = vsyncpa [#allocation3], 1 }
  0x9a   :  { %97 = vsyncpa [#allocation6], 1 }
  0x9b   :  { %98 = vsyncpa [#allocation4], 1 }

</bundles_post_ra>
